<compile_context>
chip_gen: v6e
topology: v6e:2x2x1
jax: 0.10.0
libtpu: 0.0.40
codegen_flags: <defaults>
</compile_context>

<pallas_src>
import jax
import jax.numpy as jnp
from jax.experimental import pallas as pl
from jax.experimental.pallas import tpu as pltpu

_LANE = 128
_SUBLANE = 8


def lr_kernel(wb_ref, x_ref, o_ref):
    # wb_ref: SMEM (3,) f32  -> [w0, w1, bias]
    # x_ref : VMEM (2, TILE_R, 128) f32, batch laid out lane-dense
    # o_ref : VMEM (TILE_R, 128) f32
    w0 = wb_ref[0]
    w1 = wb_ref[1]
    b = wb_ref[2]

    x0 = x_ref[0]            # (TILE_R, 128) feature 0 for this batch tile
    x1 = x_ref[1]            # (TILE_R, 128) feature 1 for this batch tile

    # Linear layer as VPU scalar-broadcast FMAs (no MXU for K=2, N=1).
    z = w0 * x0 + w1 * x1 + b
    # Sigmoid: exp on the EUP, exact divide for reference-grade accuracy.
    o_ref[...] = (1.0 / (1.0 + jnp.exp(-z))).astype(o_ref.dtype)


def _round_up(n, m):
    return ((n + m - 1) // m) * m


def lr_forward(x, weight, bias, *, tile_rows=512):
    """x: (B, 2) f32, weight: (1, 2) f32, bias: (1,) f32 -> (B, 1) f32."""
    B, in_features = x.shape
    out_features = weight.shape[0]

    # Lane-dense batch layout: batch index n -> (row = n // 128, lane = n % 128).
    rows = pl.cdiv(B, _LANE)
    tile_r = min(tile_rows, _round_up(rows, _SUBLANE))
    R = _round_up(rows, tile_r)          # total rows, multiple of tile_r
    B_pad = R * _LANE

    x_f32 = x.astype(jnp.float32)
    x_pad = jnp.pad(x_f32, ((0, B_pad - B), (0, 0)))          # (B_pad, 2)
    x_lanes = x_pad.T.reshape(in_features, R, _LANE)          # (2, R, 128)

    # Pack [w0, w1, b] as three f32 scalars for SMEM.
    wb = jnp.concatenate(
        [weight.reshape(-1), bias.reshape(-1)]).astype(jnp.float32)  # (3,)

    out_lanes = pl.pallas_call(
        lr_kernel,
        out_shape=jax.ShapeDtypeStruct((R, _LANE), jnp.float32),
        grid_spec=pltpu.PrefetchScalarGridSpec(
            num_scalar_prefetch=0,
            grid=(R // tile_r,),
            in_specs=[
                # Weights/bias: whole (3,) array resident in SMEM.
                pl.BlockSpec(memory_space=pltpu.MemorySpace.SMEM),
                # Inputs: lane-dense batch tiles, pipelined over the grid.
                pl.BlockSpec((in_features, tile_r, _LANE),
                             lambda i: (0, i, 0)),
            ],
            out_specs=pl.BlockSpec((tile_r, _LANE), lambda i: (i, 0)),
        ),
        compiler_params=pltpu.CompilerParams(
            dimension_semantics=("parallel",),
        ),
    )(wb, x_lanes)

    # Back to the PyTorch (B, 1) layout.
    return out_lanes.reshape(B_pad)[:B].reshape(B, out_features)


if __name__ == "__main__":
    key = jax.random.PRNGKey(0)
    kx, kw, kb, kx2 = jax.random.split(key, 4)

    IN, OUT = 2, 1

    # Deterministic parameter init (mirrors nn.Linear's uniform(-1/sqrt(IN), 1/sqrt(IN)))
    bound = 1.0 / jnp.sqrt(jnp.float32(IN))
    weight = jax.random.uniform(kw, (OUT, IN), jnp.float32, -bound, bound)
    bias = jax.random.uniform(kb, (OUT,), jnp.float32, -bound, bound)

    # Small-shape check (B = 8), single grid step.
    B = 8
    x = jax.random.normal(kx, (B, IN), jnp.float32)
    out = jax.block_until_ready(lr_forward(x, weight, bias))
    ref = jax.nn.sigmoid(x @ weight.T + bias)
    assert out.shape == (B, OUT)
    assert jnp.allclose(out, ref, atol=1e-5, rtol=1e-5), "mismatch vs reference (B=8)"

    # Multi-block check: small tile so the grid/pipelining path is exercised.
    B2 = 4096
    x2 = jax.random.normal(kx2, (B2, IN), jnp.float32)
    out2 = jax.block_until_ready(lr_forward(x2, weight, bias, tile_rows=8))
    ref2 = jax.nn.sigmoid(x2 @ weight.T + bias)
    assert out2.shape == (B2, OUT)
    assert jnp.allclose(out2, ref2, atol=1e-5, rtol=1e-5), "mismatch vs reference (B=4096)"

    print("KERNEL_OK")
</pallas_src>

<mosaic_0001>
module attributes {stable_mosaic.version = 11 : i64} {
  func.func @lr_kernel(%arg0: i32, %arg1: memref<3xf32, #tpu.memory_space<smem>>, %arg2: memref<2x8x128xf32, #tpu.memory_space<vmem>>, %arg3: memref<8x128xf32, #tpu.memory_space<vmem>>) attributes {dimension_semantics = [#tpu.dimension_semantics<parallel>], iteration_bounds = array<i64: 1>, scalar_prefetch = 0 : i64, scratch_operands = 0 : i64, tpu.core_type = #tpu.core_type<tc>, window_params = [{transform_indices = @transform_0, window_bounds = array<i64: 3>}, {transform_indices = @transform_1, window_bounds = array<i64: 2, 8, 128>}, {transform_indices = @transform_2, window_bounds = array<i64: 8, 128>}]} {
    %c0 = arith.constant 0 : index
    %0 = memref.load %arg1[%c0] : memref<3xf32, #tpu.memory_space<smem>>
    %c1 = arith.constant 1 : index
    %1 = memref.load %arg1[%c1] : memref<3xf32, #tpu.memory_space<smem>>
    %c2 = arith.constant 2 : index
    %2 = memref.load %arg1[%c2] : memref<3xf32, #tpu.memory_space<smem>>
    %c0_0 = arith.constant 0 : index
    %c0_1 = arith.constant 0 : index
    %c0_2 = arith.constant 0 : index
    %3 = vector.load %arg2[%c0_0, %c0_1, %c0_2] : memref<2x8x128xf32, #tpu.memory_space<vmem>>, vector<1x8x128xf32>
    %4 = vector.shape_cast %3 : vector<1x8x128xf32> to vector<8x128xf32>
    %c1_3 = arith.constant 1 : index
    %c0_4 = arith.constant 0 : index
    %c0_5 = arith.constant 0 : index
    %5 = vector.load %arg2[%c1_3, %c0_4, %c0_5] : memref<2x8x128xf32, #tpu.memory_space<vmem>>, vector<1x8x128xf32>
    %6 = vector.shape_cast %5 : vector<1x8x128xf32> to vector<8x128xf32>
    %7 = vector.broadcast %0 : f32 to vector<8x128xf32>
    %8 = arith.mulf %7, %4 : vector<8x128xf32>
    %9 = vector.broadcast %1 : f32 to vector<8x128xf32>
    %10 = arith.mulf %9, %6 : vector<8x128xf32>
    %11 = arith.addf %8, %10 : vector<8x128xf32>
    %12 = vector.broadcast %2 : f32 to vector<8x128xf32>
    %13 = arith.addf %11, %12 : vector<8x128xf32>
    %cst = arith.constant 0.000000e+00 : f32
    %14 = vector.broadcast %cst : f32 to vector<8x128xf32>
    %15 = arith.subf %14, %13 : vector<8x128xf32>
    %16 = math.exp %15 : vector<8x128xf32>
    %cst_6 = arith.constant 1.000000e+00 : f32
    %17 = vector.broadcast %cst_6 : f32 to vector<8x128xf32>
    %18 = arith.addf %17, %16 : vector<8x128xf32>
    %cst_7 = arith.constant 1.000000e+00 : f32
    %19 = vector.broadcast %cst_7 : f32 to vector<8x128xf32>
    %20 = arith.divf %19, %18 : vector<8x128xf32>
    %c0_8 = arith.constant 0 : index
    %c0_9 = arith.constant 0 : index
    %21 = vector.load %arg3[%c0_8, %c0_9] : memref<8x128xf32, #tpu.memory_space<vmem>>, vector<8x128xf32>
    tpu.vector_store %arg3[%c0_8, %c0_9], %20 {strides = array<i32>} : memref<8x128xf32, #tpu.memory_space<vmem>>, vector<8x128xf32>,
    return
  }
  func.func @transform_0(%arg0: i32) -> i32 {
    %c0_i32 = arith.constant 0 : i32
    %c0_i32_0 = arith.constant 0 : i32
    return %c0_i32 : i32
  }
  func.func @transform_1(%arg0: i32) -> (i32, i32, i32) {
    %c0_i32 = arith.constant 0 : i32
    %c0_i32_0 = arith.constant 0 : i32
    %c0_i32_1 = arith.constant 0 : i32
    return %c0_i32, %arg0, %c0_i32_0 : i32, i32, i32
  }
  func.func @transform_2(%arg0: i32) -> (i32, i32) {
    %c0_i32 = arith.constant 0 : i32
    %c0_i32_0 = arith.constant 0 : i32
    return %arg0, %c0_i32 : i32, i32
  }
}

</mosaic_0001>

<bundles_post_ra>
// kernel: tpu_custom_call.1
= control target key start
LH: loop header
LB: loop body
LE: loop exit
PB: predicated region body
PF: predicated region fallthrough
CT: control target
= control target key end

     0   :  { %7 = vsyncpa [#allocation5], 0  ;;  %s167_s0 = inlined_call_operand.hbm [shape: f32[3], index: 0, kind: input, shape index: {}]   ;;  %s168_s1 = inlined_call_operand.hbm [shape: f32[2,8,128], index: 1, kind: input, shape index: {}]   ;;  %s169_s2 = inlined_call_operand.hbm [shape: f32[8,128], index: 2, kind: output, shape index: {}]  }
   0x1   :  { %8 = vsyncpa [#allocation3], 0 }
   0x2   :  { %9 = vsyncpa [#allocation4], 0  ;;  %s138_s9 = smov [#allocation2]   ;;  %s139_s12 = smov [#allocation6]  }
   0x3   :  { %17 = dma.hbm_to_smem %s167_s0, 16, %s138_s9, [#allocation5]  }
   0x4   :  { %s23_s13 = sshll.u32 %s139_s12, 4  ;;  %s24_s13 = int_to_ptr.vmem [resolvable:$true] %s23_s13 }
   0x5   :  { %s100_s14 = scalar_lea.vmem %s24_s13, 256  ;;  %p105_p1 = scmp.lt.s32.totalorder %s24_s13, %s24_s13 }
   0x6   :  { %p101_p0 = scmp.ne.s32.totalorder %s24_s13, %s100_s14  ;;  %p106_p2 = scmp.lt.s32.totalorder %s100_s14, %s100_s14 }
   0x8   :  { %p107_p3 = por %p106_p2, %p105_p1 }
   0xa   :  { %p108_p4 = pnand %p107_p3, %p101_p0 }
   0xc   :  { %111 = shalt.err (!%p108_p4)
}
   0xd   :  { %s140_s15 = smov 128   ;;  %s141_s16 = smov 8  }
   0xe   :  { %29 = dma.hbm_to_vmem [thread:$0]  %s168_s1, 256, %s24_s13, [#allocation3], %s140_s15, %s140_s15, %s141_s16  }
   0xf   :  { %132 = dma.done.wait [#allocation5], 16  }
  0x10   :  { %133 = vsyncadd [#allocation5], 4294967280 }
  0x11   :  { %134 = dma.done.wait [#allocation3], 256  }
  0x12   :  { %135 = vsyncadd [#allocation3], 4294967040 }
  0x13   :  { %36 = sfence }
  0x14   :  { %s37_s0 = sld [smem:[#allocation2]]  ;;  %v40_v0 = vld [vmem:[#allocation6] sm:$0xff]  ;;  %v42_v1 = vld [vmem:[#allocation6 + $0x8] sm:$0xff]  ;;  %s142_s1 = smov [#allocation7]  }
  0x15   :  { %s73_s19 = sld [smem:[#allocation2 + $0x1]]  ;;  %s63_s21 = sshll.u32 %s142_s1, 4  ;;  %s64_s21 = int_to_ptr.vmem [resolvable:$true] %s63_s21 }
  0x16   :  { %s74_s20 = sld [smem:[#allocation2 + $0x2]]  ;;  %s112_s22 = scalar_lea.vmem %s64_s21, 128 }
  0x17   :  { %p113_p5 = scmp.ne.s32.totalorder %s64_s21, %s112_s22  ;;  %p117_p6 = scmp.lt.s32.totalorder %s64_s21, %s64_s21 }
  0x18   :  { %p118_p7 = scmp.lt.s32.totalorder %s112_s22, %s112_s22 }
  0x1a   :  { %v43_v2 = vstv %s37_s0  ;;  %p119_p8 = por %p118_p7, %p117_p6 }
  0x1b   :  { %v44_v3 = vmul.f32 %v43_v2, %v40_v0  ;;  %v45_v4 = vstv %s73_s19 }
  0x1c   :  { %v46_v5 = vmul.f32 %v45_v4, %v42_v1  ;;  %v48_v6 = vstv %s74_s20  ;;  %p120_p9 = pnand %p119_p8, %p113_p5 }
  0x1e   :  { %v47_v7 = vadd.f32 %v46_v5, %v44_v3 }
  0x20   :  { %v49_v8 = vadd.f32 %v48_v6, %v47_v7 }
  0x22   :  { %v50_v9 = vsub.f32 0.0, %v49_v8 }
  0x24   :  { %v51_v10 = vmul.f32 1.442695, %v50_v9 }
  0x26   :  { %80 = vpow2.f32 %v51_v10 }
  0x33   :  { %v81_v11 = vpop.eup %80 }
  0x34   :  { %v53_v12 = vadd.f32 1.0, %v81_v11 }
  0x36   :  { %82 = vrcp.f32 %v53_v12 }
  0x43   :  { %v83_v13 = vpop.eup %82 }
  0x44   :  { %56 = vst [vmem:[#allocation7] sm:$0xff] %v83_v13 }
  0x45   :  { %123 = shalt.err (!%p120_p9)
}
  0x46   :  { %66 = dma.vmem_to_hbm [thread:$0]  %s64_s21, 128, %s169_s2, [#allocation4]  }
  0x47   :  { %136 = dma.done.wait [#allocation4], 128  }
  0x48   :  { %137 = vsyncadd [#allocation4], 4294967168 }
  0x49   :  { %70 = vsyncpa [#allocation3], 1 }
  0x4a   :  { %71 = vsyncpa [#allocation4], 1 }
  0x4b   :  { %72 = vsyncpa [#allocation5], 1 }

</bundles_post_ra>
